<compile_context>
chip_gen: v5e
topology: v5e:2x2
jax: 0.10.0
libtpu: 0.0.40
codegen_flags: <defaults>
</compile_context>

<pallas_src>
import jax
import jax.numpy as jnp
from jax import lax
from jax.experimental import pallas as pl
from jax.experimental.pallas import tpu as pltpu

EPS = 1e-5  # nn.LayerNorm default


def _layernorm(x, gamma, beta):
    # x: (N, C) f32; gamma/beta: (1, C). Biased variance, eps inside rsqrt (PyTorch).
    mu = jnp.mean(x, axis=-1, keepdims=True)
    var = jnp.mean((x - mu) ** 2, axis=-1, keepdims=True)
    return (x - mu) * lax.rsqrt(var + EPS) * gamma + beta


# ---------------------------------------------------------------------------
# MixerLayer kernel (token mixing + channel mixing), one batch element / step.
# ---------------------------------------------------------------------------
def mixer_kernel(
    x_ref,                 # (1, T, C)  f32
    tg_ref, tb_ref,        # token-mix LayerNorm gamma/beta           (1, C)   f32
    tw1_ref, tb1_ref,      # token MLP Linear(T -> Ht): (T, Ht) bf16, (Ht, 1)  f32
    tw2_ref, tb2_ref,      # token MLP Linear(Ht -> T): (Ht, T) bf16, (T, 1)   f32
    cg_ref, cb_ref,        # channel-mix LayerNorm gamma/beta         (1, C)   f32
    cw1_ref, cb1_ref,      # channel MLP Linear(C -> Hc): (C, Hc) bf16, (1, Hc) f32
    cw2_ref, cb2_ref,      # channel MLP Linear(Hc -> C): (Hc, C) bf16, (1, C)  f32
    o_ref,                 # (1, T, C)  f32
):
    f32, bf16 = jnp.float32, jnp.bfloat16
    # Contract dim 0 of both operands -> no activation transposes needed.
    dn = (((0,), (0,)), ((), ()))

    x = x_ref[0]                                           # (T, C) f32

    # ---- TokenMixingMLP (channels stay on the lane axis throughout) ----
    res = _layernorm(x, tg_ref[...], tb_ref[...])          # (T, C) f32
    h = lax.dot_general(tw1_ref[...], res.astype(bf16), dn,
                        preferred_element_type=f32)        # (Ht, C) f32
    h = jax.nn.gelu(h + tb1_ref[...], approximate=False)   # exact GELU (PyTorch default)
    r = lax.dot_general(tw2_ref[...], h.astype(bf16), dn,
                        preferred_element_type=f32)        # (T, C) f32
    x1 = r + tb2_ref[...] + x                              # residual

    # ---- ChannelMixingMLP ----
    res2 = _layernorm(x1, cg_ref[...], cb_ref[...])        # (T, C) f32
    h2 = jnp.dot(res2.astype(bf16), cw1_ref[...],
                 preferred_element_type=f32) + cb1_ref[...]  # (T, Hc)
    h2 = jax.nn.gelu(h2, approximate=False)
    y = jnp.dot(h2.astype(bf16), cw2_ref[...],
                preferred_element_type=f32) + cb2_ref[...]   # (T, C)

    o_ref[0] = (y + x1).astype(o_ref.dtype)


def mixer_layer(x, p):
    """x: (B, T, C) f32; p: per-layer parameter dict (f32, PyTorch layout)."""
    B, T, C = x.shape
    Ht = p["tw1"].shape[1]
    Hc = p["cw1"].shape[1]
    bf16 = jnp.bfloat16

    # Cast the four MLP weight matrices to bf16 at the call boundary; reshape
    # the token-MLP biases to column vectors so no in-kernel transpose is needed.
    args = (
        x,
        p["tg"], p["tb"],
        p["tw1"].astype(bf16), p["tb1"].reshape(Ht, 1),
        p["tw2"].astype(bf16), p["tb2"].reshape(T, 1),
        p["cg"], p["cb"],
        p["cw1"].astype(bf16), p["cb1"],
        p["cw2"].astype(bf16), p["cb2"],
    )

    def const_spec(a):
        return pl.BlockSpec(a.shape, lambda b: (0, 0))

    in_specs = [pl.BlockSpec((1, T, C), lambda b: (b, 0, 0))]
    in_specs += [const_spec(a) for a in args[1:]]

    flops = 4 * B * T * C * (Ht + Hc)                       # 2 matmuls per branch
    transcendentals = B * (Ht * C + T * Hc)                 # erf per GELU element
    bytes_accessed = int(sum(a.size * a.dtype.itemsize for a in args)
                         + x.size * x.dtype.itemsize)       # + output

    return pl.pallas_call(
        mixer_kernel,
        out_shape=jax.ShapeDtypeStruct((B, T, C), x.dtype),
        grid_spec=pltpu.PrefetchScalarGridSpec(
            num_scalar_prefetch=0,
            grid=(B,),
            in_specs=in_specs,
            out_specs=pl.BlockSpec((1, T, C), lambda b: (b, 0, 0)),
        ),
        compiler_params=pltpu.CompilerParams(
            dimension_semantics=("parallel",),
            vmem_limit_bytes=48 * 1024 * 1024,
        ),
        cost_estimate=pl.CostEstimate(
            flops=flops, transcendentals=transcendentals, bytes_accessed=bytes_accessed),
    )(*args)


# ---------------------------------------------------------------------------
# Patch embedding: Conv2d(3 -> C, kernel=stride=patch) == patchify + matmul.
# ---------------------------------------------------------------------------
def embed_kernel(p_ref, w_ref, b_ref, o_ref):
    o_ref[0] = (jnp.dot(p_ref[0], w_ref[...], preferred_element_type=jnp.float32)
                + b_ref[...]).astype(o_ref.dtype)


def patch_embed(patches, w, b):
    B, T, P = patches.shape
    C = w.shape[1]
    return pl.pallas_call(
        embed_kernel,
        out_shape=jax.ShapeDtypeStruct((B, T, C), patches.dtype),
        grid_spec=pltpu.PrefetchScalarGridSpec(
            num_scalar_prefetch=0,
            grid=(B,),
            in_specs=[
                pl.BlockSpec((1, T, P), lambda b: (b, 0, 0)),
                pl.BlockSpec((P, C), lambda b: (0, 0)),
                pl.BlockSpec((1, C), lambda b: (0, 0)),
            ],
            out_specs=pl.BlockSpec((1, T, C), lambda b: (b, 0, 0)),
        ),
        compiler_params=pltpu.CompilerParams(dimension_semantics=("parallel",)),
    )(patches, w, b)


# ---------------------------------------------------------------------------
# Head: AdaptiveAvgPool1d(1) over tokens + Linear(C -> num_classes).
# ---------------------------------------------------------------------------
def head_kernel(x_ref, w_ref, b_ref, o_ref):
    pooled = jnp.mean(x_ref[0], axis=0, keepdims=True)      # (1, C) f32
    o_ref[...] = (jnp.dot(pooled, w_ref[...], preferred_element_type=jnp.float32)
                  + b_ref[...]).astype(o_ref.dtype)


def head(x, w, b):
    B, T, C = x.shape
    N = w.shape[1]
    return pl.pallas_call(
        head_kernel,
        out_shape=jax.ShapeDtypeStruct((B, N), x.dtype),
        grid_spec=pltpu.PrefetchScalarGridSpec(
            num_scalar_prefetch=0,
            grid=(B,),
            in_specs=[
                pl.BlockSpec((1, T, C), lambda b: (b, 0, 0)),
                pl.BlockSpec((C, N), lambda b: (0, 0)),
                pl.BlockSpec((1, N), lambda b: (0, 0)),
            ],
            out_specs=pl.BlockSpec((1, N), lambda b: (b, 0)),
        ),
        compiler_params=pltpu.CompilerParams(dimension_semantics=("parallel",)),
    )(x, w, b)


def patchify(x, patch):
    """(B, 3, H, W) -> (B, T, 3*patch*patch), ordered (c_in, ph, pw) per patch
    and row-major over patch positions -> identical to Conv2d(kernel=stride=patch)
    followed by .flatten(2).transpose(1, 2)."""
    B, Cin, H, W = x.shape
    hp, wp = H // patch, W // patch
    x = x.reshape(B, Cin, hp, patch, wp, patch)
    x = x.transpose(0, 2, 4, 1, 3, 5)
    return x.reshape(B, hp * wp, Cin * patch * patch)


def mlpmixer_forward(x_img, params):
    patches = patchify(x_img, params["patch_size"])
    x = patch_embed(patches, params["proj_w"], params["proj_b"])
    for lp in params["layers"]:
        x = mixer_layer(x, lp)
    # (the module's final self.layernorm is defined but never used in forward())
    return head(x, params["fc_w"], params["fc_b"])


# ---------------------------------------------------------------------------
# Pure-JAX f32 reference mirroring the PyTorch forward (for verification).
# ---------------------------------------------------------------------------
def reference(x_img, params):
    def ln(v, g, b):
        mu = v.mean(-1, keepdims=True)
        var = ((v - mu) ** 2).mean(-1, keepdims=True)
        return (v - mu) / jnp.sqrt(var + EPS) * g + b

    patches = patchify(x_img, params["patch_size"])
    x = patches @ params["proj_w"] + params["proj_b"]
    for p in params["layers"]:
        res = ln(x, p["tg"], p["tb"])
        r = jnp.swapaxes(res, 1, 2)
        r = jax.nn.gelu(r @ p["tw1"] + p["tb1"], approximate=False) @ p["tw2"] + p["tb2"]
        x = jnp.swapaxes(r, 1, 2) + x
        res2 = ln(x, p["cg"], p["cb"])
        h = jax.nn.gelu(res2 @ p["cw1"] + p["cb1"], approximate=False) @ p["cw2"] + p["cb2"]
        x = h + x
    pooled = x.mean(axis=1)
    return pooled @ params["fc_w"] + params["fc_b"]


if __name__ == "__main__":
    B = 2
    image = (16, 16)
    patch = 4
    num_layers = 2
    C = 16          # num_channels
    Hc = 32         # mlp_dim_channel
    Ht = 32         # mlp_dim_token
    ncls = 10
    T = (image[0] // patch) * (image[1] // patch)   # 16 tokens
    P = 3 * patch * patch                           # 48

    key = jax.random.PRNGKey(0)
    keys = iter(jax.random.split(key, 64))

    def rnd(shape, scale=0.1):
        return scale * jax.random.normal(next(keys), shape, dtype=jnp.float32)

    layers = []
    for _ in range(num_layers):
        layers.append(dict(
            tg=jnp.ones((1, C), jnp.float32), tb=jnp.zeros((1, C), jnp.float32),
            tw1=rnd((T, Ht)), tb1=rnd((1, Ht)),
            tw2=rnd((Ht, T)), tb2=rnd((1, T)),
            cg=jnp.ones((1, C), jnp.float32), cb=jnp.zeros((1, C), jnp.float32),
            cw1=rnd((C, Hc)), cb1=rnd((1, Hc)),
            cw2=rnd((Hc, C)), cb2=rnd((1, C)),
        ))

    params = dict(
        patch_size=patch,
        proj_w=rnd((P, C)), proj_b=rnd((1, C)),
        layers=layers,
        fc_w=rnd((C, ncls)), fc_b=rnd((1, ncls)),
    )

    x_img = jax.random.normal(next(keys), (B, 3, image[0], image[1]), dtype=jnp.float32)

    out = jax.block_until_ready(mlpmixer_forward(x_img, params))
    ref = reference(x_img, params)

    assert out.shape == (B, ncls)
    # Looser tolerance than pure-f32: mixer matmul operands run in bf16
    # (f32 accumulation), as recommended in the performance review.
    max_diff = float(jnp.max(jnp.abs(out - ref)))
    assert jnp.allclose(out, ref, atol=3e-2, rtol=3e-2), f"mismatch vs reference (max abs diff {max_diff})"

    print("KERNEL_OK")
</pallas_src>

<mosaic_0001>
module attributes {stable_mosaic.version = 11 : i64} {
  func.func @embed_kernel(%arg0: i32, %arg1: memref<1x16x48xf32, #tpu.memory_space<vmem>>, %arg2: memref<48x16xf32, #tpu.memory_space<vmem>>, %arg3: memref<1x16xf32, #tpu.memory_space<vmem>>, %arg4: memref<1x16x16xf32, #tpu.memory_space<vmem>>) attributes {dimension_semantics = [#tpu.dimension_semantics<parallel>], iteration_bounds = array<i64: 2>, scalar_prefetch = 0 : i64, scratch_operands = 0 : i64, tpu.core_type = #tpu.core_type<tc>, window_params = [{transform_indices = @transform_0, window_bounds = array<i64: 1, 16, 48>}, {pipeline_mode = #tpu.pipeline_mode<synchronous>, transform_indices = @transform_1, window_bounds = array<i64: 48, 16>}, {pipeline_mode = #tpu.pipeline_mode<synchronous>, transform_indices = @transform_2, window_bounds = array<i64: 1, 16>}, {transform_indices = @transform_3, window_bounds = array<i64: 1, 16, 16>}]} {
    %c0 = arith.constant 0 : index
    %c0_0 = arith.constant 0 : index
    %c0_1 = arith.constant 0 : index
    %0 = vector.load %arg1[%c0, %c0_0, %c0_1] : memref<1x16x48xf32, #tpu.memory_space<vmem>>, vector<1x16x48xf32>
    %1 = vector.shape_cast %0 : vector<1x16x48xf32> to vector<16x48xf32>
    %c0_2 = arith.constant 0 : index
    %c0_3 = arith.constant 0 : index
    %2 = vector.load %arg2[%c0_2, %c0_3] : memref<48x16xf32, #tpu.memory_space<vmem>>, vector<48x16xf32>
    %cst = arith.constant dense<0.000000e+00> : vector<16x16xf32>
    %3 = tpu.matmul %1, %2, %cst {dimension_numbers = #tpu.dot_dimension_numbers<[1], [0], [0], [1], [0, 0, 1, 1], [], []>} : vector<16x48xf32>, vector<48x16xf32>, vector<16x16xf32> -> vector<16x16xf32>
    %c0_4 = arith.constant 0 : index
    %c0_5 = arith.constant 0 : index
    %4 = vector.load %arg3[%c0_4, %c0_5] : memref<1x16xf32, #tpu.memory_space<vmem>>, vector<1x16xf32>
    %5 = vector.broadcast %4 : vector<1x16xf32> to vector<16x16xf32>
    %6 = arith.addf %3, %5 : vector<16x16xf32>
    %c0_6 = arith.constant 0 : index
    %c0_7 = arith.constant 0 : index
    %c0_8 = arith.constant 0 : index
    %7 = vector.load %arg4[%c0_6, %c0_7, %c0_8] : memref<1x16x16xf32, #tpu.memory_space<vmem>>, vector<1x16x16xf32>
    %8 = vector.shape_cast %7 : vector<1x16x16xf32> to vector<16x16xf32>
    %9 = vector.shape_cast %6 : vector<16x16xf32> to vector<1x16x16xf32>
    tpu.vector_store %arg4[%c0_6, %c0_7, %c0_8], %9 {strides = array<i32>} : memref<1x16x16xf32, #tpu.memory_space<vmem>>, vector<1x16x16xf32>,
    return
  }
  func.func @transform_0(%arg0: i32) -> (i32, i32, i32) {
    %c0_i32 = arith.constant 0 : i32
    %c0_i32_0 = arith.constant 0 : i32
    %c0_i32_1 = arith.constant 0 : i32
    return %arg0, %c0_i32, %c0_i32_0 : i32, i32, i32
  }
  func.func @transform_1(%arg0: i32) -> (i32, i32) {
    %c0_i32 = arith.constant 0 : i32
    %c0_i32_0 = arith.constant 0 : i32
    %c0_i32_1 = arith.constant 0 : i32
    return %c0_i32, %c0_i32_0 : i32, i32
  }
  func.func @transform_2(%arg0: i32) -> (i32, i32) {
    %c0_i32 = arith.constant 0 : i32
    %c0_i32_0 = arith.constant 0 : i32
    %c0_i32_1 = arith.constant 0 : i32
    return %c0_i32, %c0_i32_0 : i32, i32
  }
  func.func @transform_3(%arg0: i32) -> (i32, i32, i32) {
    %c0_i32 = arith.constant 0 : i32
    %c0_i32_0 = arith.constant 0 : i32
    %c0_i32_1 = arith.constant 0 : i32
    return %arg0, %c0_i32, %c0_i32_0 : i32, i32, i32
  }
}

</mosaic_0001>

<bundles_post_ra>
// kernel: tpu_custom_call.1
= control target key start
LH: loop header
LB: loop body
LE: loop exit
PB: predicated region body
PF: predicated region fallthrough
CT: control target
= control target key end

     0   :  { %8 = vsyncpa [#allocation3], 0  ;;  %s548_s0 = inlined_call_operand.vmem [shape: f32[2,16,48], index: 0, kind: input, shape index: {}]   ;;  %s549_s1 = inlined_call_operand.vmem [shape: f32[48,16], index: 1, kind: input, shape index: {}]   ;;  %s550_s2 = inlined_call_operand.vmem [shape: f32[1,16], index: 2, kind: input, shape index: {}]   ;;  %s551_s3 = inlined_call_operand.hbm [shape: f32[2,16,16], index: 3, kind: output, shape index: {}]  }
   0x1   :  { %10 = vsyncpa [#allocation3 + $0x1], 0  ;;  %s442_s12 = smov 0   ;;  %s444_s13 = smov 0  }
   0x2   :  { %s446_s14 = smov 0   ;;  %s448_s15 = smov 0  }
   0x3 LB: > { %s463_s16 = sadd.s32 4294967295, %s418_s15   ;;  %s292_s17 = sadd.s32 4294967294, %s418_s15   ;;  %s418_s15 = sphi %s448_s15, %s557_s15   ;;  %s414_s14 = sphi %s446_s14, %s556_s14   ;;  %s410_s13 = sphi %s444_s13, %s555_s13   ;;  %s406_s12 = sphi %s442_s12, %s554_s12  }
   0x4   : > { %s467_s18 = sadd.s32 1, %s418_s15   ;;  %s91_s19 = sadd.s32 1, %s414_s14 }
   0x5   : > { %s88_s20 = ssub.s32 %s418_s15, %s467_s18  ;;  %p101_p0 = scmp.ne.s32.totalorder %s414_s14, %s410_s13 }
   0x6   : > { %p89_p1 = scmp.eq.s32.totalorder %s88_s20, 0  ;;  %p102_p2 = scmp.eq.s32.totalorder %s463_s16, 1 }
   0x7   : > { %p107_p3 = scmp.ne.s32.totalorder %s410_s13, %s406_s12  ;;  %p108_p4 = scmp.eq.s32.totalorder %s292_s17, 1 }
   0x8   : > { %s478_s21 = scalar_select %p89_p1, %s414_s14, %s91_s19  }
   0x9   : > { %p480_p5 = por %p102_p2, %p101_p0  ;;  %p484_p6 = por %p108_p4, %p107_p3 }
   0xa   : > { %p295_p7 = scmp.ge.s32.totalorder %s418_s15, 1  ;;  %p140_p8 = scmp.lt.s32.totalorder %s418_s15, 3 }
   0xc   : > { %p141_p9 = pnand %p295_p7, %p140_p8 }
   0xd   : > { %p164_p10 = scmp.lt.s32.totalorder (!%p141_p9), %s463_s16, 1  ;;  %s161_s20 = sand.u32 (!%p141_p9), 1, %s410_s13  }
   0xe   : > { %144 = sbr.rel (%p141_p9) target bundleno = 164 (0xa4), region = 32  ;;  %s296_s24 = sshll.u32 (!%p141_p9), %s161_s20, 4 }
   0xf   : > { %s307_s25 = sshll.u32 (!%p141_p9), %s463_s16, 4  ;;  %s163_s4 = scalar_lea.vmem (!%p141_p9), [#allocation2], %s296_s24 }
  0x10   : > { %s226_s28 = scalar_lea.hbm (!%p141_p9), %s551_s3, %s307_s25  ;;  %s227_s5 = sshll.u32 (!%p141_p9), %s163_s4, 4  ;;  %s228_s5 = int_to_ptr.vmem [resolvable:$true] %s227_s5 }
  0x13   : > { %v176_v0 = vld [vmem:[%s549_s1 + $0x28] sm:$0xff]  ;;  %v175_v1 = vld [vmem:[%s549_s1 + $0x20] sm:$0xff]  ;;  %v174_v2 = vld [vmem:[%s549_s1 + $0x18] sm:$0xff]  ;;  %s165_s30 = scalar_select %p164_p10, %s463_s16, 1  ;;  %vm181_vm0 = vcmask 392192   ;;  %vm211_vm1 = vcmask 130048  }
  0x14   : > { %198 = vmatpush.msra.mxu0 %v176_v0  ;;  %308 = vmatpush.msra.mxu1 %v176_v0  ;;  %v173_v3 = vld [vmem:[%s549_s1 + $0x10] sm:$0xff]  ;;  %v172_v4 = vld [vmem:[%s549_s1 + $0x8] sm:$0xff]  ;;  %v171_v5 = vld [vmem:[%s549_s1] sm:$0xff]  ;;  %s215_s16 = scalar_lea.sflag [#allocation3], %s161_s20 }
  0x15   : > { %s306_s6 = sshll.u32 %s165_s30, 4  ;;  %v355_v8 = vld [vmem:[%s550_s2] ss:$0 sm:$0xff] }
  0x16   : > { %199 = vmatpush.msra.mxu0 %v175_v1  ;;  %309 = vmatpush.msra.mxu1 %v175_v1  ;;  %s168_s11 = scalar_lea.vmem %s548_s0, %s306_s6  ;;  %s229_s6 = sshll.u32 %s226_s28, 4  ;;  %s230_s6 = int_to_ptr.hbm [resolvable:$true] %s229_s6 }
  0x17   : > { %v169_v6 = vld [vmem:[%s168_s11] sm:$0xff]  ;;  %v170_v7 = vld [vmem:[%s168_s11 + $0x8] sm:$0xff]  ;;  %s370_s7 = sshra.s32 %s230_s6, 4  ;;  %s376_s11 = scalar_lea.hbm %s551_s3, 32  ;;  %s371_s7 = int_to_ptr.hbm [resolvable:$true] %s370_s7 }
  0x18   : > { %200 = vmatpush.msra.mxu0 %v174_v2  ;;  %310 = vmatpush.msra.mxu1 %v174_v2  ;;  %s372_s8 = scalar_lea.hbm %s371_s7, 16  ;;  %p377_p0 = scmp.lt.s32.totalorder %s371_s7, %s551_s3 }
  0x19   : > { %p373_p11 = scmp.ne.s32.totalorder %s371_s7, %s372_s8  ;;  %p378_p1 = scmp.lt.s32.totalorder %s376_s11, %s372_s8 }
  0x1a   : > { %201 = vmatpush.msra.mxu0 %v173_v3  ;;  %311 = vmatpush.msra.mxu1 %v173_v3 }
  0x1b   : > { %p374_p12 = pnand %p373_p11, %p480_p5  ;;  %p379_p2 = por %p378_p1, %p377_p0 }
  0x1c   : > { %202 = vmatpush.msra.mxu0 %v172_v4  ;;  %312 = vmatpush.msra.mxu1 %v172_v4 }
  0x1d   : > { %p375_p13 = pneg %p374_p12 }
  0x1e   : > { %203 = vmatpush.msra.mxu0 %v171_v5  ;;  %313 = vmatpush.msra.mxu1 %v171_v5 }
  0x1f   : > { %299 = vmatmul.msk.f32.vlgmr.msra.gmra.mxu0 %vm181_vm0, %v169_v6  ;;  %300 = vmatmul.msk.f32.vlgmr.msra.gmra.mxu1 %vm181_vm0, %v170_v7  ;;  %p380_p3 = pnand %p379_p2, %p375_p13 }
  0x9c   : > { %v205_v9 = vpop.f32.mrf.mxu0  ;;  %v208_v10 = vpop.f32.mrf.mxu1 }
  0x9d   : > { %v206_v11 = vadd.f32 %v355_v8, %v205_v9  ;;  %v209_v12 = vadd.f32 %v355_v8, %v208_v10 }
  0x9f   : > { %212 = vst.msk [vmem:[%s163_s4] sm:$0xff] %vm211_vm1, %v206_v11 }
  0xa0   : > { %213 = vst.msk [vmem:[%s163_s4 + $0x8] sm:$0xff] %vm211_vm1, %v209_v12 }
  0xa1   : > { %383 = shalt.err (!%p380_p3)
}
  0xa2   : > { %s420_s20 = smov 128   ;;  %s421_s24 = smov 8  }
  0xa3   : > { %314 = dma.vmem_to_hbm [thread:$0]  (%p480_p5), %s228_s5, 256, %s230_s6, %s215_s16, %s420_s20, %s420_s20, %s421_s24  }
  0xa4 PF: > { %p320_p4 = scmp.ge.s32.totalorder %s418_s15, 2  ;;  %s244_s25 = sand.u32 1, %s406_s12  }
  0xa5   : > { %s245_s26 = scalar_lea.sflag [#allocation3], %s244_s25 }
  0xa6   : > { %p317_p7 = pnand %p320_p4, %p484_p6 }
  0xa8   : > { %p318_p8 = pneg %p317_p7 }
  0xaa   : > { %401 = dma.done.wait (%p318_p8), %s245_s26, 256  }
  0xab   : > { %403 = vsyncadd (%p318_p8), %s245_s26, 4294967040  ;;  %p13_p9 = scmp.ge.s32.totalorder %s467_s18, 4   ;;  %s554_s12 = smov %s410_s13 }
  0xac   : > { %s555_s13 = smov %s414_s14  ;;  %s556_s14 = smov %s478_s21 }
  0xad   : > { %s557_s15 = smov %s467_s18  ;;  %15 = sbr.rel (!%p13_p9) target bundleno = 3 (0x3), region = 67 }
  0xb2   :  { %251 = vsyncpa [#allocation3], 1 }
  0xb3   :  { %253 = vsyncpa [#allocation3 + $0x1], 1 }

</bundles_post_ra>
